<compile_context>
chip_gen: v7x
topology: tpu7x:2x2x1
jax: 0.10.0
libtpu: 0.0.40
codegen_flags: <defaults>
</compile_context>

<pallas_src>
import functools
import math

import jax
import jax.numpy as jnp
from jax import lax
from jax.experimental import pallas as pl
from jax.experimental.pallas import tpu as pltpu

_MiB = 1024 * 1024


def _is_power_of_two(v: float) -> bool:
    if v == 0.0 or math.isinf(v) or math.isnan(v):
        return False
    m, _ = math.frexp(abs(v))
    return m == 0.5


@functools.lru_cache(maxsize=1)
def _hw_config():
    """Returns (block_bytes, vmem_limit_bytes, small_input_bytes) per TPU gen."""
    vmem = None
    try:
        vmem = int(pltpu.get_tpu_info().vmem_capacity_bytes)
    except Exception:
        pass
    if vmem is None:
        # Unknown part: 2 MiB blocks -> 8 MiB live (in+out, double-buffered)
        # fits every generation's default scoped-VMEM limit.
        return 2 * _MiB, None, 256 * 1024
    if vmem >= 96 * _MiB:
        # v5e / v6e class (128 MiB VMEM): 4 MiB blocks -> 16 MiB live.
        # Explicit vmem_limit so v5e's 16 MiB scoped default is not a cap.
        return 4 * _MiB, 40 * _MiB, 256 * 1024
    # v7x class (64 MiB VMEM per TC): faster HBM makes the ~0.35 us/step
    # overhead proportionally larger -> bigger blocks, but leave headroom.
    return 6 * _MiB, 40 * _MiB, 1 * _MiB


def _apply_op(x, operator: str, argument: float, out_dtype):
    """Elementwise op with static operator/argument; result cast to out_dtype."""
    if operator == "+":
        y = x + jnp.asarray(argument, dtype=x.dtype)
    elif operator == "-":
        y = x - jnp.asarray(argument, dtype=x.dtype)
    elif operator == "*":
        y = x * jnp.asarray(argument, dtype=x.dtype)
    elif operator == "/":
        # Power-of-two divisor -> bit-exact reciprocal multiply (pure VPU).
        # Magnitude guard keeps 1/argument a normal number even in fp16/bf16.
        if _is_power_of_two(argument) and 2.0 ** -14 <= abs(argument) <= 2.0 ** 14:
            y = x * jnp.asarray(1.0 / argument, dtype=x.dtype)
        else:
            y = x / jnp.asarray(argument, dtype=x.dtype)
    elif operator == "**":
        if float(argument).is_integer() and abs(argument) <= 64:
            # Matches torch for negative bases; avoids the EUP exp/log path.
            y = lax.integer_pow(x, int(argument))
        else:
            # Non-integer exponent: compute in f32 for bf16/fp16 accuracy.
            y = x.astype(jnp.float32) ** jnp.float32(argument)
    else:
        raise ValueError("Unknown operator:" + repr(operator))
    return y.astype(out_dtype)


def _apply_kernel(x_ref, o_ref, *, operator: str, argument: float):
    o_ref[...] = _apply_op(x_ref[...], operator, argument, o_ref.dtype)


class ApplyPallas:
    """JAX/Pallas counterpart of the PyTorch `Apply` module."""

    def __init__(self, operator: str, argument: float, *,
                 force_pallas: bool = False, block_bytes: int | None = None):
        self._operator = str(operator)
        assert self._operator in ("+", "-", "*", "/", "**")
        self._argument = float(argument)
        self._force_pallas = bool(force_pallas)
        self._block_bytes_override = block_bytes  # test hook

    # --- Pallas launch on a 2-D slab (R, L); edge blocks are masked. -------
    def _pallas_2d(self, x2d, block_bytes, vmem_limit):
        R, L = x2d.shape
        dtype = x2d.dtype
        itemsize = jnp.dtype(dtype).itemsize
        sub = 8 * max(1, 4 // itemsize)  # dtype-aware sublane multiple

        # Column tile: full width unless an 8-sublane strip would blow the
        # budget; always a multiple of 128 lanes so stores stay unmasked.
        max_tl = max(128, (block_bytes // (sub * itemsize)) // 128 * 128)
        tl = L if L <= max_tl else max_tl

        tm_target = max(sub, block_bytes // (tl * itemsize))
        if R <= tm_target:
            tm = R                           # full extent (always legal)
        else:
            tm = (tm_target // sub) * sub    # sublane-aligned row tile

        grid = (pl.cdiv(R, tm), pl.cdiv(L, tl))  # partial edge blocks masked
        kernel = functools.partial(
            _apply_kernel, operator=self._operator, argument=self._argument
        )
        return pl.pallas_call(
            kernel,
            out_shape=jax.ShapeDtypeStruct((R, L), dtype),
            grid=grid,
            in_specs=[pl.BlockSpec((tm, tl), lambda i, j: (i, j))],
            out_specs=pl.BlockSpec((tm, tl), lambda i, j: (i, j)),
            compiler_params=pltpu.CompilerParams(
                dimension_semantics=("parallel", "parallel"),
                vmem_limit_bytes=vmem_limit,
            ),
        )(x2d)

    def __call__(self, x: jax.Array) -> jax.Array:
        orig_shape = x.shape
        n = int(x.size)

        # torch promotes integer/bool tensors to the default float dtype when
        # the right operand is a python float; mirror that.
        if not jnp.issubdtype(x.dtype, jnp.floating):
            x = x.astype(jnp.float32)
        dtype = x.dtype
        itemsize = jnp.dtype(dtype).itemsize

        block_bytes, vmem_limit, small_bytes = _hw_config()
        if self._block_bytes_override is not None:
            block_bytes = int(self._block_bytes_override)

        # Tiny / empty tensors: let XLA fuse the scalar op (launch overhead
        # dominates; threshold is generation-aware).
        if n == 0 or (not self._force_pallas and n * itemsize < small_bytes):
            return _apply_op(x, self._operator, self._argument, dtype)

        # Path 1: last dim already lane-dense -> merge leading (major) dims
        # only; layout-preserving reshape, zero extra HBM passes.
        if x.ndim >= 2 and orig_shape[-1] % 128 == 0:
            L = orig_shape[-1]
            out = self._pallas_2d(x.reshape(n // L, L), block_bytes, vmem_limit)
            return out.reshape(orig_shape)

        xf = x.reshape(-1)

        # Path 2: total size divisible by a full lane width -> lane-dense
        # (rows, lane_w) slab, no padding and no output slicing.
        lane_w = next((w for w in (512, 256, 128) if n % w == 0), None)
        if lane_w is not None:
            out = self._pallas_2d(xf.reshape(n // lane_w, lane_w),
                                  block_bytes, vmem_limit)
            return out.reshape(orig_shape)

        # Path 3 (ragged): stream the 512-aligned prefix through Pallas and
        # compute the (<512-element) tail with plain jnp; avoids the old
        # jnp.pad + out[:n] full extra HBM passes.
        lane_w = 512
        n_main = (n // lane_w) * lane_w
        if n_main == 0:
            return _apply_op(xf, self._operator, self._argument,
                             dtype).reshape(orig_shape)
        main = self._pallas_2d(xf[:n_main].reshape(n_main // lane_w, lane_w),
                               block_bytes, vmem_limit).reshape(-1)
        tail = _apply_op(xf[n_main:], self._operator, self._argument, dtype)
        return jnp.concatenate([main, tail]).reshape(orig_shape)


if __name__ == "__main__":
    key = jax.random.PRNGKey(0)
    # NCHW-style input, small shapes: batch=2, channels=4, spatial=16x16.
    x = jax.random.normal(key, (2, 4, 16, 16), dtype=jnp.float32)

    def reference(x, operator, argument):
        if operator == "+":
            return x + argument
        if operator == "-":
            return x - argument
        if operator == "*":
            return x * argument
        if operator == "/":
            return x / argument
        if float(argument).is_integer():
            return lax.integer_pow(x, int(argument))
        return x ** jnp.float32(argument)

    ok = True
    for operator, argument in [("+", 1.5), ("-", 0.25), ("*", 3.0),
                               ("/", 2.0), ("**", 2.0)]:
        mod = ApplyPallas(operator, argument, force_pallas=True)
        y = jax.block_until_ready(mod(x))
        ref = reference(x, operator, argument)
        if not jnp.allclose(y, ref, rtol=1e-6, atol=1e-6):
            ok = False
            print(f"MISMATCH for operator {operator!r}")

    # Extra coverage: ragged size (prefix/tail split), lane-dense last dim
    # with a multi-block grid + masked edge block, and a bf16 input.
    k1, k2, k3 = jax.random.split(jax.random.PRNGKey(0), 3)
    x_odd = jax.random.normal(k1, (3, 5, 7, 11), dtype=jnp.float32)   # 1155 elems
    x_big = jax.random.normal(k2, (1100, 640), dtype=jnp.float32)     # last dim % 128 == 0
    x_bf = jax.random.normal(k3, (8, 256), dtype=jnp.bfloat16)

    for xt in (x_odd, x_big, x_bf):
        # Small block override forces grid > 1 and a masked edge row block.
        mod = ApplyPallas("*", 0.5, force_pallas=True, block_bytes=128 * 1024)
        y = jax.block_until_ready(mod(xt))
        ref = xt * jnp.asarray(0.5, dtype=xt.dtype)
        if not jnp.allclose(y.astype(jnp.float32), ref.astype(jnp.float32),
                            rtol=1e-6, atol=1e-6):
            ok = False
            print("MISMATCH on input", xt.shape, xt.dtype)

    if ok:
        print("KERNEL_OK")
</pallas_src>

<mosaic_0001>
module attributes {stable_mosaic.version = 11 : i64} {
  func.func @_apply_kernel(%arg0: i32, %arg1: i32, %arg2: memref<4x512xf32, #tpu.memory_space<vmem>>, %arg3: memref<4x512xf32, #tpu.memory_space<vmem>>) attributes {dimension_semantics = [#tpu.dimension_semantics<parallel>, #tpu.dimension_semantics<parallel>], iteration_bounds = array<i64: 1, 1>, scalar_prefetch = 0 : i64, scratch_operands = 0 : i64, tpu.core_type = #tpu.core_type<tc>, window_params = [{transform_indices = @transform_0, window_bounds = array<i64: 4, 512>}, {transform_indices = @transform_1, window_bounds = array<i64: 4, 512>}]} {
    %c0 = arith.constant 0 : index
    %c0_0 = arith.constant 0 : index
    %0 = vector.load %arg2[%c0, %c0_0] : memref<4x512xf32, #tpu.memory_space<vmem>>, vector<4x512xf32>
    %cst = arith.constant 1.500000e+00 : f32
    %1 = vector.broadcast %cst : f32 to vector<4x512xf32>
    %2 = arith.addf %0, %1 : vector<4x512xf32>
    %c0_1 = arith.constant 0 : index
    %c0_2 = arith.constant 0 : index
    %3 = vector.load %arg3[%c0_1, %c0_2] : memref<4x512xf32, #tpu.memory_space<vmem>>, vector<4x512xf32>
    tpu.vector_store %arg3[%c0_1, %c0_2], %2 {strides = array<i32>} : memref<4x512xf32, #tpu.memory_space<vmem>>, vector<4x512xf32>,
    return
  }
  func.func @transform_0(%arg0: i32, %arg1: i32) -> (i32, i32) {
    %c0_i32 = arith.constant 0 : i32
    return %arg0, %arg1 : i32, i32
  }
  func.func @transform_1(%arg0: i32, %arg1: i32) -> (i32, i32) {
    %c0_i32 = arith.constant 0 : i32
    return %arg0, %arg1 : i32, i32
  }
}

</mosaic_0001>

<bundles_post_ra>
// kernel: tpu_custom_call.1
= control target key start
LH: loop header
LB: loop body
LE: loop exit
PB: predicated region body
PF: predicated region fallthrough
CT: control target
= control target key end

     0   :  { %6 = vsyncpa [#allocation3], 0  ;;  %s128_s0 = inlined_call_operand.hbm [shape: f32[4,512], index: 0, kind: input, shape index: {}]   ;;  %s129_s1 = inlined_call_operand.hbm [shape: f32[4,512], index: 1, kind: output, shape index: {}]  }
   0x1   :  { %7 = vsyncpa [#allocation4], 0  ;;  %s92_s6 = smov [#allocation2]   ;;  %s44_s10 = scalar_lea.hbm %s128_s0, 256 }
   0x2   :  { %s14_s7 = sshll.u32 %s92_s6, 4  ;;  %p45_p0 = scmp.ne.s32.totalorder %s128_s0, %s44_s10  ;;  %s15_s7 = int_to_ptr.vmem [resolvable:$true] %s14_s7 }
   0x3   :  { %p48_p1 = scmp.lt.u32.totalorder %s44_s10, %s128_s0 }
   0x5   :  { %p50_p2 = pnand %p48_p1, %p45_p0 }
   0x7   :  { %53 = shalt.err (!%p50_p2)
}
   0x8   :  { %s54_s15 = scalar_lea.vmem %s15_s7, 256  ;;  %p59_p4 = scmp.lt.s32.totalorder %s15_s7, %s15_s7 }
   0x9   :  { %p55_p3 = scmp.ne.s32.totalorder %s15_s7, %s54_s15  ;;  %p60_p5 = scmp.lt.s32.totalorder %s54_s15, %s54_s15 }
   0xb   :  { %p61_p6 = por %p60_p5, %p59_p4 }
   0xd   :  { %p62_p7 = pnand %p61_p6, %p55_p3 }
   0xf   :  { %65 = shalt.err (!%p62_p7)
}
  0x10   :  { %17 = dma.hbm_to_vmem [thread:$0]  %s128_s0, 256, %s15_s7, [#allocation3]  }
  0x11   :  { %88 = dma.done.wait [#allocation3], 256  }
  0x12   :  { %89 = vsyncadd [#allocation3], 4294967040  ;;  %s93_s18 = smov [#allocation5]   ;;  %v21_v0 = vld [vmem:[#allocation2] sm:$0xff]  ;;  %v22_v1 = vld [vmem:[#allocation2 + $0x8] sm:$0xff] }
  0x13   :  { %s33_s19 = sshll.u32 %s93_s18, 4  ;;  %v23_v2 = vadd.f32 1.5, %v21_v0  ;;  %v24_v3 = vadd.f32 1.5, %v22_v1  ;;  %s34_s19 = int_to_ptr.vmem [resolvable:$true] %s33_s19 }
  0x14   :  { %s66_s20 = scalar_lea.vmem %s34_s19, 256  ;;  %p71_p9 = scmp.lt.s32.totalorder %s34_s19, %s34_s19 }
  0x15   :  { %25 = vst [vmem:[#allocation5] sm:$0xff] %v23_v2  ;;  %26 = vst [vmem:[#allocation5 + $0x8] sm:$0xff] %v24_v3  ;;  %p67_p8 = scmp.ne.s32.totalorder %s34_s19, %s66_s20  ;;  %p72_p10 = scmp.lt.s32.totalorder %s66_s20, %s66_s20 }
  0x17   :  { %p73_p11 = por %p72_p10, %p71_p9 }
  0x19   :  { %p74_p12 = pnand %p73_p11, %p67_p8 }
  0x1b   :  { %77 = shalt.err (!%p74_p12)
}
  0x1c   :  { %s78_s22 = scalar_lea.hbm %s129_s1, 256 }
  0x1d   :  { %p79_p13 = scmp.ne.s32.totalorder %s129_s1, %s78_s22  ;;  %p82_p0 = scmp.lt.u32.totalorder %s78_s22, %s129_s1 }
  0x1f   :  { %p84_p1 = pnand %p82_p0, %p79_p13 }
  0x21   :  { %87 = shalt.err (!%p84_p1)
}
  0x22   :  { %36 = dma.vmem_to_hbm [thread:$0]  %s34_s19, 256, %s129_s1, [#allocation4]  }
  0x23   :  { %90 = dma.done.wait [#allocation4], 256  }
  0x24   :  { %91 = vsyncadd [#allocation4], 4294967040 }
  0x25   :  { %40 = vsyncpa [#allocation3], 1 }
  0x26   :  { %41 = vsyncpa [#allocation4], 1 }

</bundles_post_ra>
